<compile_context>
chip_gen: v5e
topology: v5e:2x2
jax: 0.10.0
libtpu: 0.0.40
codegen_flags: <defaults>
</compile_context>

<pallas_src>
import jax
import jax.numpy as jnp
from jax.experimental import pallas as pl
from jax.experimental.pallas import tpu as pltpu

# ------------------------- problem sizes -------------------------
B, C, H, W = 2, 4, 16, 16        # NCHW input (PyTorch convention)
D = C * H * W                    # 1024 flattened features
HID = 32                         # encoder/decoder hidden width
LAT = 8                          # latent dimension

WIDE = 128                       # lane-dense width used for all hidden blocks
MIN_ROWS = 16                    # min batch tile (bf16 sublane packing = 16)

# parameter-slab layout (f32, [SLAB_ROWS, 128])
ROW_B1 = 0                       # b1 padded to 128 lanes
ROW_BST = 1                      # bmu | blv | zeros
ROW_B3 = 2                       # b3 padded; lane HID == 1.0 (folds b4 into w4)
ROW_WST = 8                      # wmu|wlv zero-padded to [128, 128]
ROW_W3 = ROW_WST + WIDE          # w3 zero-padded to [LAT, 128]
SLAB_ROWS = ROW_W3 + LAT         # 144 rows


# ------------------------- Pallas kernel -------------------------
def vae_fwd_kernel(
    x_ref,       # [BM, D]            bf16
    w1_ref,      # [D, 128]           bf16 (cols >= HID are zero)
    slab_ref,    # [SLAB_ROWS, 128]   f32 packed small params
    eps_ref,     # [BM, LAT]          f32 reparameterization noise
    w4_ref,      # [128, D]           bf16 (row HID = b4, rows > HID zero)
    recon_ref,   # out: [BM, D]       bf16
    stats_ref,   # out: [BM, 128]     f32  (mu | logvar | zero pad)
):
    f32 = jnp.float32
    bf16 = jnp.bfloat16

    # ---- encode ----  (bf16 MXU operands, f32 accumulation / elementwise)
    h1 = jnp.dot(x_ref[...], w1_ref[...], preferred_element_type=f32)    # [BM,128]
    h1 = jnp.maximum(h1 + slab_ref[ROW_B1:ROW_B1 + 1, :], 0.0)           # ReLU, lane-dense

    # fused mu/logvar projection: one [128, 128] matmul, lane-dense result
    wst = slab_ref[ROW_WST:ROW_WST + WIDE, :].astype(bf16)               # [128, 128]
    bst = slab_ref[ROW_BST:ROW_BST + 1, :]                               # [1, 128]
    stats = jnp.dot(h1.astype(bf16), wst, preferred_element_type=f32) + bst

    mu = stats[:, :LAT]
    logvar = stats[:, LAT:2 * LAT]

    # ---- reparameterize: z = mu + exp(0.5 * logvar) * eps ----
    z = mu + jnp.exp(0.5 * logvar) * eps_ref[...]                        # [BM, LAT]

    # ---- decode ----
    w3 = slab_ref[ROW_W3:ROW_W3 + LAT, :].astype(bf16)                   # [LAT, 128]
    b3 = slab_ref[ROW_B3:ROW_B3 + 1, :]                                  # [1, 128]; lane HID == 1.0
    h2 = jnp.maximum(jnp.dot(z.astype(bf16), w3,
                             preferred_element_type=f32) + b3, 0.0)      # [BM, 128] lane-dense

    # b4 is folded into w4 row HID (h2 lane HID is exactly 1.0)
    logits = jnp.dot(h2.astype(bf16), w4_ref[...], preferred_element_type=f32)

    # EUP-routed sigmoid: exp + approximate reciprocal (output is bf16 anyway)
    recon = pl.reciprocal(1.0 + jnp.exp(-logits), approx=True)
    recon_ref[...] = recon.astype(recon_ref.dtype)
    stats_ref[...] = stats


# ------------------------- tiling config -------------------------
def _round_up(x, m):
    return ((x + m - 1) // m) * m


def _tile_config(batch):
    """Generation-aware batch tile; >=2 grid steps on v7x when possible."""
    try:
        kind = jax.devices()[0].device_kind.lower()
    except Exception:  # pragma: no cover - defensive
        kind = ""
    full = 128 if "v5" in kind else 256          # v5e: 4x128^2 MXU; v6e/v7x: 2x256^2
    b_pad = _round_up(max(batch, 1), MIN_ROWS)
    bm = min(full, b_pad)
    if ("v7" in kind or "7x" in kind) and b_pad >= 2 * MIN_ROWS:
        bm = min(bm, _round_up((b_pad + 1) // 2, MIN_ROWS))   # let both TCs get a tile
    bp = _round_up(b_pad, bm)
    return bm, bp


# ------------------------- wrapper -------------------------
def vae_forward(x_nchw, packed, eps):
    """x_nchw: [B,C,H,W] f32 -> (recon [B,C,H,W] f32, mu [B,LAT], logvar [B,LAT])."""
    b, c, h, w = x_nchw.shape
    d = c * h * w
    assert d == D

    bm, bp = _tile_config(b)

    # bf16 activations for the batch-scaled HBM streams; pad batch to bp rows
    x_pad = jnp.zeros((bp, D), jnp.bfloat16).at[:b].set(
        x_nchw.reshape(b, D).astype(jnp.bfloat16))
    eps_pad = jnp.zeros((bp, LAT), jnp.float32).at[:b].set(eps)

    grid = (bp // bm,)

    in_specs = [
        pl.BlockSpec((bm, D), lambda i: (i, 0)),                 # x (batch-tiled, bf16)
        pl.BlockSpec((D, WIDE), lambda i: (0, 0)),               # w1 padded (bf16)
        pl.BlockSpec((SLAB_ROWS, WIDE), lambda i: (0, 0)),       # packed small params
        pl.BlockSpec((bm, LAT), lambda i: (i, 0)),               # eps (batch-tiled)
        pl.BlockSpec((WIDE, D), lambda i: (0, 0)),               # w4 padded + b4 row (bf16)
    ]
    out_specs = (
        pl.BlockSpec((bm, D), lambda i: (i, 0)),                 # recon (bf16, lane-dense)
        pl.BlockSpec((bm, WIDE), lambda i: (i, 0)),              # mu|logvar slab
    )

    flops = 2 * bp * (D * WIDE + WIDE * WIDE + LAT * WIDE + WIDE * D)
    transcendentals = bp * (LAT + D)                 # exp in reparam + sigmoid
    bytes_accessed = (x_pad.size * 2 + packed["w1_pad"].size * 2
                      + packed["slab"].size * 4 + eps_pad.size * 4
                      + packed["w4_pad"].size * 2
                      + bp * D * 2 + bp * WIDE * 4)

    recon_pad, stats = pl.pallas_call(
        vae_fwd_kernel,
        out_shape=(
            jax.ShapeDtypeStruct((bp, D), jnp.bfloat16),
            jax.ShapeDtypeStruct((bp, WIDE), jnp.float32),
        ),
        grid=grid,
        in_specs=in_specs,
        out_specs=out_specs,
        compiler_params=pltpu.CompilerParams(
            dimension_semantics=("parallel",),       # shards batch tiles across TCs
            vmem_limit_bytes=16 << 20,
        ),
        cost_estimate=pl.CostEstimate(
            flops=int(flops),
            transcendentals=int(transcendentals),
            bytes_accessed=int(bytes_accessed),
        ),
    )(x_pad, packed["w1_pad"], packed["slab"], eps_pad, packed["w4_pad"])

    recon = recon_pad[:b].astype(jnp.float32).reshape(b, c, h, w)
    mu = stats[:b, :LAT]
    logvar = stats[:b, LAT:2 * LAT]
    return recon, mu, logvar


# ------------------------- deterministic params -------------------------
def init_params(key):
    ks = jax.random.split(key, 5)
    s = 0.05
    return {
        "w1":  s * jax.random.normal(ks[0], (D, HID), jnp.float32),
        "b1":  jnp.zeros((HID,), jnp.float32),
        "wmu": s * jax.random.normal(ks[1], (HID, LAT), jnp.float32),
        "bmu": jnp.zeros((LAT,), jnp.float32),
        "wlv": s * jax.random.normal(ks[2], (HID, LAT), jnp.float32),
        "blv": jnp.zeros((LAT,), jnp.float32),
        "w3":  s * jax.random.normal(ks[3], (LAT, HID), jnp.float32),
        "b3":  jnp.zeros((HID,), jnp.float32),
        "w4":  s * jax.random.normal(ks[4], (HID, D), jnp.float32),
        "b4":  jnp.zeros((D,), jnp.float32),
    }


def pack_params(p):
    """Pack small params into one lane-dense f32 slab; big weights -> padded bf16.

    Invariant: all padding rows/columns are exactly zero (the kernel relies on
    ReLU(0)=0 and zero-padded weight rows to keep lane-dense blocks correct).
    """
    slab = jnp.zeros((SLAB_ROWS, WIDE), jnp.float32)
    slab = slab.at[ROW_B1, :HID].set(p["b1"])
    slab = slab.at[ROW_BST, :LAT].set(p["bmu"])
    slab = slab.at[ROW_BST, LAT:2 * LAT].set(p["blv"])
    slab = slab.at[ROW_B3, :HID].set(p["b3"])
    slab = slab.at[ROW_B3, HID].set(1.0)                         # ones lane -> b4 fold
    slab = slab.at[ROW_WST:ROW_WST + HID, :LAT].set(p["wmu"])
    slab = slab.at[ROW_WST:ROW_WST + HID, LAT:2 * LAT].set(p["wlv"])
    slab = slab.at[ROW_W3:ROW_W3 + LAT, :HID].set(p["w3"])

    w1_pad = jnp.zeros((D, WIDE), jnp.bfloat16)
    w1_pad = w1_pad.at[:, :HID].set(p["w1"].astype(jnp.bfloat16))

    w4_pad = jnp.zeros((WIDE, D), jnp.bfloat16)
    w4_pad = w4_pad.at[:HID, :].set(p["w4"].astype(jnp.bfloat16))
    w4_pad = w4_pad.at[HID, :].set(p["b4"].astype(jnp.bfloat16))  # folded bias row

    return {"w1_pad": w1_pad, "w4_pad": w4_pad, "slab": slab}


# ------------------------- pure-JAX reference -------------------------
def reference_forward(x_nchw, p, eps):
    """Reference mirroring the kernel numerics (bf16 MXU operands, f32 accum)."""
    f32, bf16 = jnp.float32, jnp.bfloat16
    x = x_nchw.reshape(x_nchw.shape[0], -1).astype(bf16)
    h1 = jnp.dot(x, p["w1"].astype(bf16), preferred_element_type=f32) + p["b1"]
    h1 = jnp.maximum(h1, 0.0)
    h1b = h1.astype(bf16)
    mu = jnp.dot(h1b, p["wmu"].astype(bf16), preferred_element_type=f32) + p["bmu"]
    lv = jnp.dot(h1b, p["wlv"].astype(bf16), preferred_element_type=f32) + p["blv"]
    z = mu + jnp.exp(0.5 * lv) * eps
    h2 = jnp.maximum(jnp.dot(z.astype(bf16), p["w3"].astype(bf16),
                             preferred_element_type=f32) + p["b3"], 0.0)
    logits = (jnp.dot(h2.astype(bf16), p["w4"].astype(bf16),
                      preferred_element_type=f32)
              + p["b4"].astype(bf16).astype(f32))
    recon = jax.nn.sigmoid(logits)
    return recon.reshape(x_nchw.shape), mu, lv


# ------------------------- main -------------------------
if __name__ == "__main__":
    key = jax.random.PRNGKey(0)
    k_x, k_p, k_eps = jax.random.split(key, 3)

    x = jax.random.uniform(k_x, (B, C, H, W), jnp.float32)   # NCHW input
    params = init_params(k_p)
    packed = pack_params(params)
    eps = jax.random.normal(k_eps, (B, LAT), jnp.float32)    # fixed reparam noise

    recon, mu, logvar = vae_forward(x, packed, eps)
    jax.block_until_ready((recon, mu, logvar))

    # sanity check against a pure-JAX reference with matching numerics
    r_ref, mu_ref, lv_ref = reference_forward(x, params, eps)
    assert recon.shape == (B, C, H, W)
    assert mu.shape == (B, LAT) and logvar.shape == (B, LAT)
    assert jnp.allclose(mu, mu_ref, atol=1e-3, rtol=1e-3)
    assert jnp.allclose(logvar, lv_ref, atol=1e-3, rtol=1e-3)
    # recon is bf16 + approx-reciprocal sigmoid -> compare with looser tolerance
    assert jnp.allclose(recon, r_ref, atol=1e-2, rtol=1e-2)

    print("KERNEL_OK")
</pallas_src>

<mosaic_0001>
module attributes {stable_mosaic.version = 11 : i64} {
  func.func @vae_fwd_kernel(%arg0: i32, %arg1: memref<16x1024xbf16, #tpu.memory_space<vmem>>, %arg2: memref<1024x128xbf16, #tpu.memory_space<vmem>>, %arg3: memref<144x128xf32, #tpu.memory_space<vmem>>, %arg4: memref<16x8xf32, #tpu.memory_space<vmem>>, %arg5: memref<128x1024xbf16, #tpu.memory_space<vmem>>, %arg6: memref<16x1024xbf16, #tpu.memory_space<vmem>>, %arg7: memref<16x128xf32, #tpu.memory_space<vmem>>) attributes {dimension_semantics = [#tpu.dimension_semantics<parallel>], iteration_bounds = array<i64: 1>, scalar_prefetch = 0 : i64, scratch_operands = 0 : i64, tpu.core_type = #tpu.core_type<tc>, window_params = [{transform_indices = @transform_0, window_bounds = array<i64: 16, 1024>}, {pipeline_mode = #tpu.pipeline_mode<synchronous>, transform_indices = @transform_1, window_bounds = array<i64: 1024, 128>}, {pipeline_mode = #tpu.pipeline_mode<synchronous>, transform_indices = @transform_2, window_bounds = array<i64: 144, 128>}, {transform_indices = @transform_3, window_bounds = array<i64: 16, 8>}, {pipeline_mode = #tpu.pipeline_mode<synchronous>, transform_indices = @transform_4, window_bounds = array<i64: 128, 1024>}, {transform_indices = @transform_5, window_bounds = array<i64: 16, 1024>}, {transform_indices = @transform_6, window_bounds = array<i64: 16, 128>}]} {
    %c0 = arith.constant 0 : index
    %c0_0 = arith.constant 0 : index
    %0 = vector.load %arg1[%c0, %c0_0] : memref<16x1024xbf16, #tpu.memory_space<vmem>>, vector<16x1024xbf16>
    %c0_1 = arith.constant 0 : index
    %c0_2 = arith.constant 0 : index
    %1 = vector.load %arg2[%c0_1, %c0_2] : memref<1024x128xbf16, #tpu.memory_space<vmem>>, vector<1024x128xbf16>
    %cst = arith.constant dense<0.000000e+00> : vector<16x128xf32>
    %2 = tpu.matmul %0, %1, %cst {dimension_numbers = #tpu.dot_dimension_numbers<[1], [0], [0], [1], [0, 0, 1, 1], [], []>} : vector<16x1024xbf16>, vector<1024x128xbf16>, vector<16x128xf32> -> vector<16x128xf32>
    %c0_3 = arith.constant 0 : index
    %c0_4 = arith.constant 0 : index
    %3 = vector.load %arg3[%c0_3, %c0_4] : memref<144x128xf32, #tpu.memory_space<vmem>>, vector<1x128xf32>
    %4 = vector.broadcast %3 : vector<1x128xf32> to vector<16x128xf32>
    %5 = arith.addf %2, %4 : vector<16x128xf32>
    %cst_5 = arith.constant 0.000000e+00 : f32
    %6 = vector.broadcast %cst_5 : f32 to vector<16x128xf32>
    %7 = arith.maximumf %5, %6 : vector<16x128xf32>
    %c8 = arith.constant 8 : index
    %c0_6 = arith.constant 0 : index
    %8 = vector.load %arg3[%c8, %c0_6] : memref<144x128xf32, #tpu.memory_space<vmem>>, vector<128x128xf32>
    %9 = arith.truncf %8 : vector<128x128xf32> to vector<128x128xbf16>
    %c1 = arith.constant 1 : index
    %c0_7 = arith.constant 0 : index
    %10 = vector.load %arg3[%c1, %c0_7] : memref<144x128xf32, #tpu.memory_space<vmem>>, vector<1x128xf32>
    %11 = arith.truncf %7 : vector<16x128xf32> to vector<16x128xbf16>
    %cst_8 = arith.constant dense<0.000000e+00> : vector<16x128xf32>
    %12 = tpu.matmul %11, %9, %cst_8 {dimension_numbers = #tpu.dot_dimension_numbers<[1], [0], [0], [1], [0, 0, 1, 1], [], []>} : vector<16x128xbf16>, vector<128x128xbf16>, vector<16x128xf32> -> vector<16x128xf32>
    %13 = vector.broadcast %10 : vector<1x128xf32> to vector<16x128xf32>
    %14 = arith.addf %12, %13 : vector<16x128xf32>
    %15 = vector.extract_strided_slice %14 {offsets = [0, 0], sizes = [16, 8], strides = [1, 1]} : vector<16x128xf32> to vector<16x8xf32>
    %16 = vector.extract_strided_slice %14 {offsets = [0, 8], sizes = [16, 8], strides = [1, 1]} : vector<16x128xf32> to vector<16x8xf32>
    %cst_9 = arith.constant 5.000000e-01 : f32
    %17 = vector.broadcast %cst_9 : f32 to vector<16x8xf32>
    %18 = arith.mulf %17, %16 : vector<16x8xf32>
    %19 = math.exp %18 : vector<16x8xf32>
    %c0_10 = arith.constant 0 : index
    %c0_11 = arith.constant 0 : index
    %20 = vector.load %arg4[%c0_10, %c0_11] : memref<16x8xf32, #tpu.memory_space<vmem>>, vector<16x8xf32>
    %21 = arith.mulf %19, %20 : vector<16x8xf32>
    %22 = arith.addf %15, %21 : vector<16x8xf32>
    %c136 = arith.constant 136 : index
    %c0_12 = arith.constant 0 : index
    %23 = vector.load %arg3[%c136, %c0_12] : memref<144x128xf32, #tpu.memory_space<vmem>>, vector<8x128xf32>
    %24 = arith.truncf %23 : vector<8x128xf32> to vector<8x128xbf16>
    %c2 = arith.constant 2 : index
    %c0_13 = arith.constant 0 : index
    %25 = vector.load %arg3[%c2, %c0_13] : memref<144x128xf32, #tpu.memory_space<vmem>>, vector<1x128xf32>
    %26 = arith.truncf %22 : vector<16x8xf32> to vector<16x8xbf16>
    %cst_14 = arith.constant dense<0.000000e+00> : vector<16x128xf32>
    %27 = tpu.matmul %26, %24, %cst_14 {dimension_numbers = #tpu.dot_dimension_numbers<[1], [0], [0], [1], [0, 0, 1, 1], [], []>} : vector<16x8xbf16>, vector<8x128xbf16>, vector<16x128xf32> -> vector<16x128xf32>
    %28 = vector.broadcast %25 : vector<1x128xf32> to vector<16x128xf32>
    %29 = arith.addf %27, %28 : vector<16x128xf32>
    %cst_15 = arith.constant 0.000000e+00 : f32
    %30 = vector.broadcast %cst_15 : f32 to vector<16x128xf32>
    %31 = arith.maximumf %29, %30 : vector<16x128xf32>
    %32 = arith.truncf %31 : vector<16x128xf32> to vector<16x128xbf16>
    %c0_16 = arith.constant 0 : index
    %c0_17 = arith.constant 0 : index
    %33 = vector.load %arg5[%c0_16, %c0_17] : memref<128x1024xbf16, #tpu.memory_space<vmem>>, vector<128x1024xbf16>
    %cst_18 = arith.constant dense<0.000000e+00> : vector<16x1024xf32>
    %34 = tpu.matmul %32, %33, %cst_18 {dimension_numbers = #tpu.dot_dimension_numbers<[1], [0], [0], [1], [0, 0, 1, 1], [], []>} : vector<16x128xbf16>, vector<128x1024xbf16>, vector<16x1024xf32> -> vector<16x1024xf32>
    %cst_19 = arith.constant 0.000000e+00 : f32
    %35 = vector.broadcast %cst_19 : f32 to vector<16x1024xf32>
    %36 = arith.subf %35, %34 : vector<16x1024xf32>
    %37 = math.exp %36 : vector<16x1024xf32>
    %cst_20 = arith.constant 1.000000e+00 : f32
    %38 = vector.broadcast %cst_20 : f32 to vector<16x1024xf32>
    %39 = arith.addf %38, %37 : vector<16x1024xf32>
    %40 = tpu.reciprocal %39 {approx = true} : vector<16x1024xf32> -> vector<16x1024xf32>
    %41 = arith.truncf %40 : vector<16x1024xf32> to vector<16x1024xbf16>
    %c0_21 = arith.constant 0 : index
    %c0_22 = arith.constant 0 : index
    %42 = vector.load %arg6[%c0_21, %c0_22] : memref<16x1024xbf16, #tpu.memory_space<vmem>>, vector<16x1024xbf16>
    tpu.vector_store %arg6[%c0_21, %c0_22], %41 {strides = array<i32>} : memref<16x1024xbf16, #tpu.memory_space<vmem>>, vector<16x1024xbf16>,
    %c0_23 = arith.constant 0 : index
    %c0_24 = arith.constant 0 : index
    %43 = vector.load %arg7[%c0_23, %c0_24] : memref<16x128xf32, #tpu.memory_space<vmem>>, vector<16x128xf32>
    tpu.vector_store %arg7[%c0_23, %c0_24], %14 {strides = array<i32>} : memref<16x128xf32, #tpu.memory_space<vmem>>, vector<16x128xf32>,
    return
  }
  func.func @transform_0(%arg0: i32) -> (i32, i32) {
    %c0_i32 = arith.constant 0 : i32
    %c0_i32_0 = arith.constant 0 : i32
    return %arg0, %c0_i32 : i32, i32
  }
  func.func @transform_1(%arg0: i32) -> (i32, i32) {
    %c0_i32 = arith.constant 0 : i32
    %c0_i32_0 = arith.constant 0 : i32
    %c0_i32_1 = arith.constant 0 : i32
    return %c0_i32, %c0_i32_0 : i32, i32
  }
  func.func @transform_2(%arg0: i32) -> (i32, i32) {
    %c0_i32 = arith.constant 0 : i32
    %c0_i32_0 = arith.constant 0 : i32
    %c0_i32_1 = arith.constant 0 : i32
    return %c0_i32, %c0_i32_0 : i32, i32
  }
  func.func @transform_3(%arg0: i32) -> (i32, i32) {
    %c0_i32 = arith.constant 0 : i32
    %c0_i32_0 = arith.constant 0 : i32
    return %arg0, %c0_i32 : i32, i32
  }
  func.func @transform_4(%arg0: i32) -> (i32, i32) {
    %c0_i32 = arith.constant 0 : i32
    %c0_i32_0 = arith.constant 0 : i32
    %c0_i32_1 = arith.constant 0 : i32
    return %c0_i32, %c0_i32_0 : i32, i32
  }
  func.func @transform_5(%arg0: i32) -> (i32, i32) {
    %c0_i32 = arith.constant 0 : i32
    %c0_i32_0 = arith.constant 0 : i32
    return %arg0, %c0_i32 : i32, i32
  }
  func.func @transform_6(%arg0: i32) -> (i32, i32) {
    %c0_i32 = arith.constant 0 : i32
    %c0_i32_0 = arith.constant 0 : i32
    return %arg0, %c0_i32 : i32, i32
  }
}

</mosaic_0001>

<bundles_post_ra>
// kernel: tpu_custom_call.1
= control target key start
LH: loop header
LB: loop body
LE: loop exit
PB: predicated region body
PF: predicated region fallthrough
CT: control target
= control target key end

     0   :  { %12 = vsyncpa [#allocation3], 0  ;;  %s2514_s0 = inlined_call_operand.hbm [shape: bf16[16,1024], index: 0, kind: input, shape index: {}]   ;;  %s2515_s1 = inlined_call_operand.hbm [shape: bf16[1024,128], index: 1, kind: input, shape index: {}]   ;;  %s2516_s2 = inlined_call_operand.hbm [shape: f32[144,128], index: 2, kind: input, shape index: {}]   ;;  %s2517_s3 = inlined_call_operand.vmem [shape: f32[16,8], index: 3, kind: input, shape index: {}]   ;;  %s2518_s4 = inlined_call_operand.hbm [shape: bf16[128,1024], index: 4, kind: input, shape index: {}]   ;;  %s2519_s5 = inlined_call_operand.hbm [shape: bf16[16,1024], index: 5, kind: output, shape index: {0}]   ;;  %s2520_s6 = inlined_call_operand.hbm [shape: f32[16,128], index: 6, kind: output, shape index: {1}]  }
   0x1   :  { %13 = vsyncpa [#allocation6], 0 }
   0x2   :  { %14 = vsyncpa [#allocation9], 0 }
   0x3   :  { %15 = vsyncpa [#allocation4], 0  ;;  %s34_s23 = sshll.u32 %s2515_s1, 4  ;;  %s35_s23 = int_to_ptr.hbm [resolvable:$true] %s34_s23 }
   0x4   :  { %16 = vsyncpa [#allocation12], 0  ;;  %s2415_s24 = smov [#allocation5]   ;;  %s21_s28 = sshll.u32 %s2514_s0, 4  ;;  %s22_s28 = int_to_ptr.hbm [resolvable:$true] %s21_s28 }
   0x5   :  { %s36_s25 = sshll.u32 %s2415_s24, 4  ;;  %s2416_s29 = smov 64   ;;  %s37_s25 = int_to_ptr.vmem [resolvable:$true] %s36_s25 }
   0x6   :  { %s2417_s30 = smov 4   ;;  %s2418_s7 = smov [#allocation2]  }
   0x7   :  { %42 = dma.hbm_to_vmem [thread:$0]  %s35_s23, 8192, %s37_s25, [#allocation6], %s2416_s29, %s2416_s29, %s2417_s30  }
   0x8   :  { %s23_s8 = sshll.u32 %s2418_s7, 4  ;;  %s2419_s9 = smov 512   ;;  %s24_s8 = int_to_ptr.vmem [resolvable:$true] %s23_s8 }
   0x9   :  { %s2420_s10 = smov 32   ;;  %s47_s12 = sshll.u32 %s2516_s2, 4  ;;  %s48_s12 = int_to_ptr.hbm [resolvable:$true] %s47_s12 }
   0xa   :  { %29 = dma.hbm_to_vmem [thread:$0]  %s22_s28, 1024, %s24_s8, [#allocation3], %s2419_s9, %s2419_s9, %s2420_s10  }
   0xb   :  { %s2421_s13 = smov [#allocation7]   ;;  %s62_s16 = sshll.u32 %s2518_s4, 4  ;;  %s63_s16 = int_to_ptr.hbm [resolvable:$true] %s62_s16 }
   0xc   :  { %s49_s0 = sshll.u32 %s2421_s13, 4  ;;  %s2422_s17 = smov 128   ;;  %s50_s0 = int_to_ptr.vmem [resolvable:$true] %s49_s0 }
   0xd   :  { %s2423_s18 = smov 8   ;;  %s2424_s19 = smov [#allocation8]  }
   0xe   :  { %55 = dma.hbm_to_vmem [thread:$0]  %s48_s12, 2304, %s50_s0, [#allocation6], %s2422_s17, %s2422_s17, %s2423_s18  }
   0xf   :  { %s64_s20 = sshll.u32 %s2424_s19, 4  ;;  %s65_s20 = int_to_ptr.vmem [resolvable:$true] %s64_s20 }
  0x10   :  { %70 = dma.hbm_to_vmem [thread:$0]  %s63_s16, 8192, %s65_s20, [#allocation9], %s2419_s9, %s2419_s9, %s2420_s10  }
  0x11   :  { %2405 = dma.done.wait [#allocation3], 1024  }
  0x12   :  { %2406 = vsyncadd [#allocation3], 4294966272 }
  0x13   :  { %2407 = dma.done.wait [#allocation6], 10496  }
  0x14   :  { %2408 = vsyncadd [#allocation6], 4294956800 }
  0x15   :  { %2409 = dma.done.wait [#allocation9], 8192  }
  0x16   :  { %2410 = vsyncadd [#allocation9], 4294959104  ;;  %v2056_v0 = vld [vmem:[#allocation5 + $0x38] sm:$0xff]  ;;  %v2055_v4 = vld [vmem:[#allocation5 + $0x30] sm:$0xff]  ;;  %vm842_vm0 = vcmask 1043456   ;;  %vm838_vm1 = vcmask 64512  }
  0x17   :  { %v2064_v1 = vld [vmem:[#allocation5 + $0x78] sm:$0xff]  ;;  %650 = vmatpush.bf16.msra.mxu0 %v2056_v0  ;;  %v2063_v5 = vld [vmem:[#allocation5 + $0x70] sm:$0xff]  ;;  %v2054_v8 = vld [vmem:[#allocation5 + $0x28] sm:$0xff]  ;;  %s2426_s23 = smov [#allocation11]   ;;  %s1476_s27 = sshll.u32 %s2520_s6, 4  ;;  %s1477_s27 = int_to_ptr.hbm [resolvable:$true] %s1476_s27 }
  0x18   :  { %v2072_v2 = vld [vmem:[#allocation5 + $0xb8] sm:$0xff]  ;;  %664 = vmatpush.bf16.msra.mxu1 %v2064_v1  ;;  %v2071_v6 = vld [vmem:[#allocation5 + $0xb0] sm:$0xff]  ;;  %v2062_v9 = vld [vmem:[#allocation5 + $0x68] sm:$0xff]  ;;  %s1474_s24 = sshll.u32 %s2426_s23, 4  ;;  %s2427_s6 = smov [#allocation10]   ;;  %s1475_s24 = int_to_ptr.vmem [resolvable:$true] %s1474_s24 }
  0x19   :  { %v2080_v3 = vld [vmem:[#allocation5 + $0xf8] sm:$0xff]  ;;  %678 = vmatpush.bf16.msra.mxu2 %v2072_v2  ;;  %v2079_v7 = vld [vmem:[#allocation5 + $0xf0] sm:$0xff]  ;;  %v2070_v10 = vld [vmem:[#allocation5 + $0xa8] sm:$0xff]  ;;  %s1461_s28 = sshll.u32 %s2427_s6, 4  ;;  %s1463_s7 = sshll.u32 %s2519_s5, 4  ;;  %s1462_s28 = int_to_ptr.vmem [resolvable:$true] %s1461_s28  ;;  %s1464_s7 = int_to_ptr.hbm [resolvable:$true] %s1463_s7 }
  0x1a   :  { %692 = vmatpush.bf16.msra.mxu3 %v2080_v3  ;;  %v2078_v11 = vld [vmem:[#allocation5 + $0xe8] sm:$0xff]  ;;  %v2053_v12 = vld [vmem:[#allocation5 + $0x20] sm:$0xff]  ;;  %v2052_v16 = vld [vmem:[#allocation5 + $0x18] sm:$0xff] }
  0x1b   :  { %651 = vmatpush.bf16.msra.mxu0 %v2055_v4  ;;  %v2061_v13 = vld [vmem:[#allocation5 + $0x60] sm:$0xff]  ;;  %v2060_v17 = vld [vmem:[#allocation5 + $0x58] sm:$0xff]  ;;  %v2051_v20 = vld [vmem:[#allocation5 + $0x10] sm:$0xff] }
  0x1c   :  { %665 = vmatpush.bf16.msra.mxu1 %v2063_v5  ;;  %v2069_v14 = vld [vmem:[#allocation5 + $0xa0] sm:$0xff]  ;;  %v2068_v18 = vld [vmem:[#allocation5 + $0x98] sm:$0xff]  ;;  %v2059_v21 = vld [vmem:[#allocation5 + $0x50] sm:$0xff] }
  0x1d   :  { %679 = vmatpush.bf16.msra.mxu2 %v2071_v6  ;;  %v2077_v15 = vld [vmem:[#allocation5 + $0xe0] sm:$0xff]  ;;  %v2076_v19 = vld [vmem:[#allocation5 + $0xd8] sm:$0xff]  ;;  %v2067_v22 = vld [vmem:[#allocation5 + $0x90] sm:$0xff] }
  0x1e   :  { %693 = vmatpush.bf16.msra.mxu3 %v2079_v7  ;;  %v2075_v23 = vld [vmem:[#allocation5 + $0xd0] sm:$0xff]  ;;  %v2050_v24 = vld [vmem:[#allocation5 + $0x8] sm:$0xff]  ;;  %v2049_v28 = vld [vmem:[#allocation5] sm:$0xff] }
  0x1f   :  { %652 = vmatpush.bf16.msra.mxu0 %v2054_v8  ;;  %v2058_v25 = vld [vmem:[#allocation5 + $0x48] sm:$0xff]  ;;  %v2057_v29 = vld [vmem:[#allocation5 + $0x40] sm:$0xff]  ;;  %v2088_v32 = vld [vmem:[#allocation5 + $0x138] sm:$0xff] }
  0x20   :  { %666 = vmatpush.bf16.msra.mxu1 %v2062_v9  ;;  %v2066_v26 = vld [vmem:[#allocation5 + $0x88] sm:$0xff]  ;;  %v2065_v30 = vld [vmem:[#allocation5 + $0x80] sm:$0xff]  ;;  %v2096_v33 = vld [vmem:[#allocation5 + $0x178] sm:$0xff] }
  0x21   :  { %680 = vmatpush.bf16.msra.mxu2 %v2070_v10  ;;  %v2074_v27 = vld [vmem:[#allocation5 + $0xc8] sm:$0xff]  ;;  %v2073_v31 = vld [vmem:[#allocation5 + $0xc0] sm:$0xff]  ;;  %v2104_v42 = vld [vmem:[#allocation5 + $0x1b8] sm:$0xff] }
  0x22   :  { %694 = vmatpush.bf16.msra.mxu3 %v2078_v11  ;;  %v1506_v34 = vld [vmem:[#allocation2 + $0x8] sm:$0xf]  ;;  %v1498_v36 = vld [vmem:[#allocation2] sm:$0xf]  ;;  %v2042_v38 = vld [vmem:[#allocation2 + $0xc] sm:$0xf] }
  0x23   :  { %653 = vmatpush.bf16.msra.mxu0 %v2053_v12  ;;  %v2046_v35 = vld [vmem:[#allocation2 + $0x24] sm:$0xf0]  ;;  %v2045_v37 = vld [vmem:[#allocation2 + $0x1c] sm:$0xf0]  ;;  %v1508_v39 = vld [vmem:[#allocation2 + $0x28] sm:$0xf0] }
  0x24   :  { %667 = vmatpush.bf16.msra.mxu1 %v2061_v13  ;;  %v2041_v40 = vld [vmem:[#allocation2 + $0x4] sm:$0xf]  ;;  %v2112_v43 = vld [vmem:[#allocation5 + $0x1f8] sm:$0xff]  ;;  %v1507_v44 = vor.u32 %v2046_v35, %v1506_v34  ;;  %v1499_v45 = vor.u32 %v2045_v37, %v1498_v36  ;;  %v1511_v46 = vor.u32 %v2042_v38, %v1508_v39  ;;  %v2087_v48 = vld [vmem:[#allocation5 + $0x130] sm:$0xff] }
  0x25   :  { %681 = vmatpush.bf16.msra.mxu2 %v2069_v14  ;;  %v1500_v41 = vld [vmem:[#allocation2 + $0x20] sm:$0xf0]  ;;  %v2095_v49 = vld [vmem:[#allocation5 + $0x170] sm:$0xff]  ;;  %v2086_v52 = vld [vmem:[#allocation5 + $0x128] sm:$0xff] }
  0x26   :  { %695 = vmatpush.bf16.msra.mxu3 %v2077_v15  ;;  %v1503_v47 = vor.u32 %v2041_v40, %v1500_v41  ;;  %v2103_v50 = vld [vmem:[#allocation5 + $0x1b0] sm:$0xff]  ;;  %v2094_v53 = vld [vmem:[#allocation5 + $0x168] sm:$0xff]  ;;  %v2085_v56 = vld [vmem:[#allocation5 + $0x120] sm:$0xff] }
  0x27   :  { %654 = vmatpush.bf16.msra.mxu0 %v2052_v16  ;;  %v2111_v51 = vld [vmem:[#allocation5 + $0x1f0] sm:$0xff]  ;;  %v2102_v54 = vld [vmem:[#allocation5 + $0x1a8] sm:$0xff]  ;;  %v2093_v57 = vld [vmem:[#allocation5 + $0x160] sm:$0xff] }
  0x28   :  { %668 = vmatpush.bf16.msra.mxu1 %v2060_v17  ;;  %v2110_v55 = vld [vmem:[#allocation5 + $0x1e8] sm:$0xff]  ;;  %v2101_v58 = vld [vmem:[#allocation5 + $0x1a0] sm:$0xff]  ;;  %v2084_v60 = vld [vmem:[#allocation5 + $0x118] sm:$0xff] }
  0x29   :  { %682 = vmatpush.bf16.msra.mxu2 %v2068_v18  ;;  %v2109_v59 = vld [vmem:[#allocation5 + $0x1e0] sm:$0xff]  ;;  %v2092_v61 = vld [vmem:[#allocation5 + $0x158] sm:$0xff]  ;;  %v2083_v0 = vld [vmem:[#allocation5 + $0x110] sm:$0xff] }
  0x2a   :  { %696 = vmatpush.bf16.msra.mxu3 %v2076_v19  ;;  %v2100_v62 = vld [vmem:[#allocation5 + $0x198] sm:$0xff]  ;;  %v2091_v1 = vld [vmem:[#allocation5 + $0x150] sm:$0xff]  ;;  %v2082_v4 = vld [vmem:[#allocation5 + $0x108] sm:$0xff] }
  0x2b   :  { %655 = vmatpush.bf16.msra.mxu0 %v2051_v20  ;;  %v2108_v63 = vld [vmem:[#allocation5 + $0x1d8] sm:$0xff]  ;;  %v2099_v2 = vld [vmem:[#allocation5 + $0x190] sm:$0xff]  ;;  %v2090_v5 = vld [vmem:[#allocation5 + $0x148] sm:$0xff] }
  0x2c   :  { %669 = vmatpush.bf16.msra.mxu1 %v2059_v21  ;;  %v2107_v3 = vld [vmem:[#allocation5 + $0x1d0] sm:$0xff]  ;;  %v2098_v6 = vld [vmem:[#allocation5 + $0x188] sm:$0xff]  ;;  %v2081_v8 = vld [vmem:[#allocation5 + $0x100] sm:$0xff] }
  0x2d   :  { %683 = vmatpush.bf16.msra.mxu2 %v2067_v22  ;;  %v2106_v7 = vld [vmem:[#allocation5 + $0x1c8] sm:$0xff]  ;;  %v2089_v9 = vld [vmem:[#allocation5 + $0x140] sm:$0xff]  ;;  %v1514_v12 = vld [vmem:[#allocation2 + $0x10] sm:$0xf] }
  0x2e   :  { %697 = vmatpush.bf16.msra.mxu3 %v2075_v23  ;;  %v2097_v10 = vld [vmem:[#allocation5 + $0x180] sm:$0xff]  ;;  %v2047_v13 = vld [vmem:[#allocation2 + $0x2c] sm:$0xf0]  ;;  %v2043_v14 = vld [vmem:[#allocation2 + $0x14] sm:$0xf] }
  0x2f   :  { %656 = vmatpush.bf16.msra.mxu0 %v2050_v24  ;;  %v2105_v11 = vld [vmem:[#allocation5 + $0x1c0] sm:$0xff]  ;;  %v1516_v15 = vld [vmem:[#allocation2 + $0x30] sm:$0xf0]  ;;  %v1522_v16 = vld [vmem:[#allocation2 + $0x18] sm:$0xf]  ;;  %v1515_v20 = vor.u32 %v2047_v13, %v1514_v12 }
  0x30   :  { %670 = vmatpush.bf16.msra.mxu1 %v2058_v25  ;;  %v2048_v17 = vld [vmem:[#allocation2 + $0x34] sm:$0xf0]  ;;  %v2044_v18 = vld [vmem:[#allocation2 + $0x1c] sm:$0xf]  ;;  %v1519_v21 = vor.u32 %v2043_v14, %v1516_v15  ;;  %v779_v25 = vld [vmem:[#allocation7 + $0x80] sm:$0xff] }
  0x31   :  { %684 = vmatpush.bf16.msra.mxu2 %v2066_v26  ;;  %v1524_v19 = vld [vmem:[#allocation2 + $0x38] sm:$0xf0]  ;;  %v1523_v22 = vor.u32 %v2048_v17, %v1522_v16  ;;  %v776_v26 = vld [vmem:[#allocation7 + $0x68] sm:$0xff]  ;;  %v773_v34 = vld [vmem:[#allocation7 + $0x50] sm:$0xff] }
  0x32   :  { %698 = vmatpush.bf16.msra.mxu3 %v2074_v27  ;;  %v1527_v23 = vor.u32 %v2044_v18, %v1524_v19  ;;  %v778_v24 = vld [vmem:[#allocation7 + $0x78] sm:$0xff]  ;;  %v771_v37 = vld [vmem:[#allocation7 + $0x40] sm:$0xff]  ;;  %v768_v39 = vld [vmem:[#allocation7 + $0x28] sm:$0xff] }
  0x33   :  { %657 = vmatpush.bf16.msra.mxu0 %v2049_v28  ;;  %v787_v27 = vpack.c.bf16 %v779_v25, %v778_v24  ;;  %v777_v28 = vld [vmem:[#allocation7 + $0x70] sm:$0xff]  ;;  %v770_v36 = vld [vmem:[#allocation7 + $0x38] sm:$0xff]  ;;  %v2191_v25 = vld [vmem:[#allocation7 + $0x1] ss:$0 sm:$0xff] }
  0x34   :  { %671 = vmatpush.bf16.msra.mxu1 %v2057_v29  ;;  %v786_v29 = vpack.c.bf16 %v777_v28, %v776_v26  ;;  %v783_v38 = vpack.c.bf16 %v771_v37, %v770_v36  ;;  %v769_v40 = vld [vmem:[#allocation7 + $0x30] sm:$0xff] }
  0x35   :  { %685 = vmatpush.bf16.msra.mxu2 %v2065_v30  ;;  %v774_v30 = vld [vmem:[#allocation7 + $0x58] sm:$0xff]  ;;  %v782_v41 = vpack.c.bf16 %v769_v40, %v768_v39  ;;  %v2011_v40 = vld [vmem:[#allocation8 + $0x1c0] sm:$0xf] }
  0x36   :  { %699 = vmatpush.bf16.msra.mxu3 %v2073_v31  ;;  %658 = vmatmul.bf16.vlgmr.msra.gmra.mxu0 %v1499_v45  ;;  %v775_v31 = vld [vmem:[#allocation7 + $0x60] sm:$0xff] }
  0x37   :  { %706 = vmatpush.bf16.msrb.mxu0 %v2088_v32  ;;  %672 = vmatmul.bf16.vlgmr.msra.gmra.mxu1 %v1503_v47  ;;  %v785_v32 = vpack.c.bf16 %v775_v31, %v774_v30  ;;  %v764_v47 = vld [vmem:[#allocation7 + $0x8] sm:$0xff] }
  0x38   :  { %720 = vmatpush.bf16.msrb.mxu1 %v2096_v33  ;;  %686 = vmatmul.bf16.vlgmr.msra.gmra.mxu2 %v1507_v44  ;;  %v772_v33 = vld [vmem:[#allocation7 + $0x48] sm:$0xff]  ;;  %v767_v44 = vld [vmem:[#allocation7 + $0x20] sm:$0xff] }
  0x39   :  { %734 = vmatpush.bf16.msrb.mxu2 %v2104_v42  ;;  %700 = vmatmul.bf16.vlgmr.msra.gmra.mxu3 %v1511_v46  ;;  %v784_v35 = vpack.c.bf16 %v773_v34, %v772_v33 }
  0x3a   :  { %748 = vmatpush.bf16.msrb.mxu3 %v2112_v43  ;;  %v766_v43 = vld [vmem:[#allocation7 + $0x18] sm:$0xff] }
  0x3b   :  { %707 = vmatpush.bf16.msrb.mxu0 %v2087_v48  ;;  %v781_v45 = vpack.c.bf16 %v767_v44, %v766_v43  ;;  %v765_v48 = vld [vmem:[#allocation7 + $0x10] sm:$0xff] }
  0x3c   :  { %721 = vmatpush.bf16.msrb.mxu1 %v2095_v49  ;;  %v780_v49 = vpack.c.bf16 %v765_v48, %v764_v47  ;;  %v2013_v44 = vld [vmem:[#allocation8 + $0x1e0] sm:$0xf0] }
  0x3d   :  { %735 = vmatpush.bf16.msrb.mxu2 %v2103_v50  ;;  %v2190_v50 = vld [vmem:[#allocation7] ss:$0 sm:$0xff] }
  0x3e   :  { %749 = vmatpush.bf16.msrb.mxu3 %v2111_v51 }
  0x3f   :  { %708 = vmatpush.bf16.msrb.mxu0 %v2086_v52 }
  0x40   :  { %722 = vmatpush.bf16.msrb.mxu1 %v2094_v53 }
  0x41   :  { %736 = vmatpush.bf16.msrb.mxu2 %v2102_v54 }
  0x42   :  { %750 = vmatpush.bf16.msrb.mxu3 %v2110_v55  ;;  %v811_v55 = vld [vmem:[%s2517_s3] sm:$0xff] }
  0x43   :  { %709 = vmatpush.bf16.msrb.mxu0 %v2085_v56  ;;  %815 = vrot.lane.b32.xlu0 %v811_v55, %s2423_s18  ;;  %v1981_v55 = vld [vmem:[#allocation8 + $0x1a0] sm:$0xf0] }
  0x44   :  { %723 = vmatpush.bf16.msrb.mxu1 %v2093_v57 }
  0x45   :  { %737 = vmatpush.bf16.msrb.mxu2 %v2101_v58 }
  0x46   :  { %751 = vmatpush.bf16.msrb.mxu3 %v2109_v59  ;;  %v812_v59 = vld [vmem:[%s2517_s3 + $0x8] sm:$0xff]  ;;  %s2425_s3 = smov 120  }
  0x47   :  { %710 = vmatpush.bf16.msrb.mxu0 %v2084_v60 }
  0x48   :  { %724 = vmatpush.bf16.msrb.mxu1 %v2092_v61 }
  0x49   :  { %738 = vmatpush.bf16.msrb.mxu2 %v2100_v62 }
  0x4a   :  { %752 = vmatpush.bf16.msrb.mxu3 %v2108_v63 }
  0x4b   :  { %711 = vmatpush.bf16.msrb.mxu0 %v2083_v0  ;;  %817 = vrot.lane.b32.xlu0 %v812_v59, %s2423_s18  ;;  %v2166_v59 = vld [vmem:[#allocation8 + $0x1a4] sm:$0xf0] }
  0x4c   :  { %725 = vmatpush.bf16.msrb.mxu1 %v2091_v1 }
  0x4d   :  { %739 = vmatpush.bf16.msrb.mxu2 %v2099_v2 }
  0x4e   :  { %753 = vmatpush.bf16.msrb.mxu3 %v2107_v3 }
  0x4f   :  { %712 = vmatpush.bf16.msrb.mxu0 %v2082_v4 }
  0x50   :  { %726 = vmatpush.bf16.msrb.mxu1 %v2090_v5 }
  0x51   :  { %740 = vmatpush.bf16.msrb.mxu2 %v2098_v6 }
  0x52   :  { %754 = vmatpush.bf16.msrb.mxu3 %v2106_v7 }
  0x53   :  { %713 = vmatpush.bf16.msrb.mxu0 %v2081_v8 }
  0x54   :  { %727 = vmatpush.bf16.msrb.mxu1 %v2089_v9 }
  0x55   :  { %741 = vmatpush.bf16.msrb.mxu2 %v2097_v10 }
  0x56   :  { %755 = vmatpush.bf16.msrb.mxu3 %v2105_v11  ;;  %714 = vmatmul.bf16.vlgmr.msrb.gmra.mxu0 %v1515_v20 }
  0x57   :  { %728 = vmatmul.bf16.vlgmr.msrb.gmra.mxu1 %v1519_v21  ;;  %791 = vmatpush.bf16.msra.mxu0 %v787_v27 }
  0x58   :  { %742 = vmatmul.bf16.vlgmr.msrb.gmra.mxu2 %v1523_v22  ;;  %v833_v22 = vld [vmem:[#allocation7 + $0x88] sm:$0xff] }
  0x59   :  { %756 = vmatmul.bf16.vlgmr.msrb.gmra.mxu3 %v1527_v23  ;;  %v834_v23 = vpack.c.bf16 %v833_v22, %v833_v22 }
  0x5b   :  { %792 = vmatpush.bf16.msra.mxu0 %v786_v29  ;;  %v844_v24 = vsel %vm842_vm0, %v834_v23, 0  ;;  %v1883_v23 = vld [vmem:[#allocation8 + $0xc0] sm:$0xf] }
  0x5c   :  { %853 = vmatpush.bf16.msra.mxu1 %v844_v24  ;;  %v2141_v24 = vld [vmem:[#allocation8 + $0xdc] sm:$0xf0] }
  0x5f   :  { %793 = vmatpush.bf16.msra.mxu0 %v785_v32 }
  0x63   :  { %794 = vmatpush.bf16.msra.mxu0 %v784_v35 }
  0x67   :  { %795 = vmatpush.bf16.msra.mxu0 %v783_v38 }
  0x6b   :  { %796 = vmatpush.bf16.msra.mxu0 %v782_v41  ;;  %v2173_v41 = vld [vmem:[#allocation8 + $0x1dc] sm:$0xf0] }
  0x6c   :  { %v2012_v43 = vor.u32 %v2173_v41, %v2011_v40  ;;  %v1853_v41 = vld [vmem:[#allocation8 + $0xa0] sm:$0xf0] }
  0x6e   :  { %1247 = vmatpush.bf16.msra.mxu2 %v2012_v43  ;;  %v2134_v43 = vld [vmem:[#allocation8 + $0xa4] sm:$0xf0] }
  0x6f   :  { %797 = vmatpush.bf16.msra.mxu0 %v781_v45  ;;  %v2019_v45 = vld [vmem:[#allocation8 + $0x1c8] sm:$0xf] }
  0x73   :  { %798 = vmatpush.bf16.msra.mxu0 %v780_v49  ;;  %v2170_v49 = vld [vmem:[#allocation8 + $0x1cc] sm:$0xf] }
  0xb3   :  { %v659_v42 = vpop.f32.mrf.mxu0 }
  0xb4   :  { %v673_v46 = vpop.f32.mrf.mxu1  ;;  %v660_v53 = vadd.f32 %v2190_v50, %v659_v42  ;;  %v2169_v42 = vld [vmem:[#allocation8 + $0x1c4] sm:$0xf] }
  0xb5   :  { %v816_v32 = vpop.permute.xlu0 %815  ;;  %v2016_v47 = vor.u32 %v2169_v42, %v2013_v44  ;;  %v1859_v42 = vld [vmem:[#allocation8 + $0x88] sm:$0xf]  ;;  %v2130_v44 = vld [vmem:[#allocation8 + $0x8c] sm:$0xf] }
  0xb6   :  { %v674_v57 = vadd.f32 %v673_v46, %v660_v53  ;;  %v2174_v46 = vld [vmem:[#allocation8 + $0x1e4] sm:$0xf0]  ;;  %v2165_v53 = vld [vmem:[#allocation8 + $0x19c] sm:$0xf0] }
  0xb7   :  { %v2020_v48 = vor.u32 %v2174_v46, %v2019_v45  ;;  %1261 = vmatpush.bf16.msra.mxu3 %v2016_v47  ;;  %v1861_v45 = vld [vmem:[#allocation8 + $0xa8] sm:$0xf0] }
  0xb9   :  { %1275 = vmatpush.bf16.msrb.mxu1 %v2020_v48 }
  0xbb   :  { %v687_v51 = vpop.f32.mrf.mxu2  ;;  %v661_v54 = vpop.f32.mrf.mxu0 }
  0xbc   :  { %v701_v52 = vpop.f32.mrf.mxu3  ;;  %v675_v56 = vpop.f32.mrf.mxu1  ;;  %v662_v58 = vadd.f32 %v2190_v50, %v661_v54  ;;  %v688_v62 = vadd.f32 %v687_v51, %v674_v57  ;;  %v2021_v50 = vld [vmem:[#allocation8 + $0x1e8] sm:$0xf0]  ;;  %v1979_v51 = vld [vmem:[#allocation8 + $0x180] sm:$0xf]  ;;  %v2161_v54 = vld [vmem:[#allocation8 + $0x184] sm:$0xf] }
  0xbd   :  { %v818_v37 = vpop.permute.xlu0 %817  ;;  %v1984_v57 = vor.u32 %v2161_v54, %v1981_v55  ;;  %v1821_v54 = vld [vmem:[#allocation8 + $0x60] sm:$0xf0]  ;;  %v1827_v55 = vld [vmem:[#allocation8 + $0x48] sm:$0xf] }
  0xbe   :  { %v676_v63 = vadd.f32 %v675_v56, %v662_v58  ;;  %v702_v2 = vadd.f32 %v701_v52, %v688_v62  ;;  %v2024_v52 = vor.u32 %v2170_v49, %v2021_v50  ;;  %v1980_v56 = vor.u32 %v2165_v53, %v1979_v51  ;;  %v1987_v58 = vld [vmem:[#allocation8 + $0x188] sm:$0xf]  ;;  %v1989_v62 = vld [vmem:[#allocation8 + $0x1a8] sm:$0xf0]  ;;  %v1819_v50 = vld [vmem:[#allocation8 + $0x40] sm:$0xf] }
  0xbf   :  { %1262 = vmatpush.bf16.msra.mxu3 %v1984_v57  ;;  %v1860_v49 = vor.u32 %v2134_v43, %v1859_v42  ;;  %v2125_v51 = vld [vmem:[#allocation8 + $0x5c] sm:$0xf0]  ;;  %v1864_v53 = vor.u32 %v2130_v44, %v1861_v45  ;;  %v2122_v57 = vld [vmem:[#allocation8 + $0x4c] sm:$0xf]  ;;  %v1965_v43 = vld [vmem:[#allocation8 + $0x170] sm:$0xf0] }
  0xc0   :  { %1289 = vmatpush.bf16.msrb.mxu0 %v2024_v52  ;;  %1248 = vmatpush.bf16.msra.mxu2 %v1980_v56  ;;  %v2121_v52 = vld [vmem:[#allocation8 + $0x44] sm:$0xf]  ;;  %v2126_v56 = vld [vmem:[#allocation8 + $0x64] sm:$0xf0]  ;;  %v1971_v44 = vld [vmem:[#allocation8 + $0x158] sm:$0xf] }
  0xc1   :  { %v2160_v45 = vld [vmem:[#allocation8 + $0x174] sm:$0xf0] }
  0xc3   :  { %v689_v60 = vpop.f32.mrf.mxu2 }
  0xc4   :  { %v703_v61 = vpop.f32.mrf.mxu3  ;;  %v690_v3 = vadd.f32 %v689_v60, %v676_v63  ;;  %v2162_v60 = vld [vmem:[#allocation8 + $0x18c] sm:$0xf]  ;;  %v1947_v63 = vld [vmem:[#allocation8 + $0x140] sm:$0xf] }
  0xc6   :  { %v704_v7 = vadd.f32 %v703_v61, %v690_v3  ;;  %v1988_v61 = vor.u32 %v2166_v59, %v1987_v58  ;;  %v1949_v3 = vld [vmem:[#allocation8 + $0x160] sm:$0xf0]  ;;  %v1829_v58 = vld [vmem:[#allocation8 + $0x68] sm:$0xf0]  ;;  %v1820_v59 = vor.u32 %v2125_v51, %v1819_v50  ;;  %v1931_v51 = vld [vmem:[#allocation8 + $0x110] sm:$0xf] }
  0xc8   :  { %1276 = vmatpush.bf16.msrb.mxu1 %v1988_v61  ;;  %v1828_v61 = vor.u32 %v2126_v56, %v1827_v55  ;;  %v1933_v55 = vld [vmem:[#allocation8 + $0x130] sm:$0xf0]  ;;  %v1939_v56 = vld [vmem:[#allocation8 + $0x118] sm:$0xf] }
  0xd3   :  { %v715_v0 = vpop.f32.mrf.mxu0 }
  0xd4   :  { %v729_v1 = vpop.f32.mrf.mxu1  ;;  %v716_v4 = vadd.f32 %v715_v0, %v702_v2  ;;  %v2157_v0 = vld [vmem:[#allocation8 + $0x15c] sm:$0xf0]  ;;  %v2153_v2 = vld [vmem:[#allocation8 + $0x144] sm:$0xf] }
  0xd6   :  { %v730_v9 = vadd.f32 %v729_v1, %v716_v4  ;;  %v1992_v1 = vor.u32 %v2162_v60, %v1989_v62  ;;  %v1955_v4 = vld [vmem:[#allocation8 + $0x148] sm:$0xf]  ;;  %v1824_v60 = vor.u32 %v2121_v52, %v1821_v54  ;;  %v1787_v62 = vld [vmem:[#allocation8] sm:$0xf]  ;;  %v2151_v52 = vld [vmem:[#allocation8 + $0x12c] sm:$0xf0] }
  0xd7   :  { %v1932_v54 = vor.u32 %v2151_v52, %v1931_v51 }
  0xd8   :  { %1290 = vmatpush.bf16.msrb.mxu0 %v1992_v1  ;;  %v2113_v1 = vld [vmem:[#allocation8 + $0x4] sm:$0xf] }
  0xdb   :  { %v743_v5 = vpop.f32.mrf.mxu2  ;;  %v717_v8 = vpop.f32.mrf.mxu0 }
  0xdc   :  { %v757_v6 = vpop.f32.mrf.mxu3  ;;  %v718_v10 = vadd.f32 %v717_v8, %v704_v7  ;;  %v744_v11 = vadd.f32 %v743_v5, %v730_v9  ;;  %v731_v12 = vpop.f32.mrf.mxu1  ;;  %v1948_v5 = vor.u32 %v2157_v0, %v1947_v63  ;;  %v2154_v7 = vld [vmem:[#allocation8 + $0x14c] sm:$0xf]  ;;  %v1952_v9 = vor.u32 %v2153_v2, %v1949_v3  ;;  %v2117_v63 = vld [vmem:[#allocation8 + $0x1c] sm:$0xf0]  ;;  %v1789_v2 = vld [vmem:[#allocation8 + $0x20] sm:$0xf0] }
  0xdd   :  { %v1957_v8 = vld [vmem:[#allocation8 + $0x168] sm:$0xf0]  ;;  %v1832_v0 = vor.u32 %v2122_v57, %v1829_v58  ;;  %v1795_v3 = vld [vmem:[#allocation8 + $0x8] sm:$0xf]  ;;  %v2152_v57 = vld [vmem:[#allocation8 + $0x134] sm:$0xf0] }
  0xde   :  { %v732_v13 = vadd.f32 %v731_v12, %v718_v10  ;;  %v758_v15 = vadd.f32 %v757_v6, %v744_v11  ;;  %v2158_v6 = vld [vmem:[#allocation8 + $0x164] sm:$0xf0]  ;;  %v1915_v11 = vld [vmem:[#allocation8 + $0x100] sm:$0xf]  ;;  %1249 = vmatpush.bf16.msra.mxu2 %v1948_v5  ;;  %1263 = vmatpush.bf16.msra.mxu3 %v1952_v9  ;;  %v2114_v5 = vld [vmem:[#allocation8 + $0xc] sm:$0xf] }
  0xdf   :  { %v1956_v10 = vor.u32 %v2158_v6, %v1955_v4  ;;  %v2149_v12 = vld [vmem:[#allocation8 + $0x11c] sm:$0xf0]  ;;  %v2118_v4 = vld [vmem:[#allocation8 + $0x24] sm:$0xf0]  ;;  %v1797_v6 = vld [vmem:[#allocation8 + $0x28] sm:$0xf0] }
  0xe0   :  { %v762_v19 = vmax.f32 %v758_v15, 0.0  ;;  %v1917_v15 = vld [vmem:[#allocation8 + $0x120] sm:$0xf0] }
  0xe1   :  { %1277 = vmatpush.bf16.msrb.mxu1 %v1956_v10 }
  0xe3   :  { %v745_v14 = vpop.f32.mrf.mxu2 }
  0xe4   :  { %v746_v16 = vadd.f32 %v745_v14, %v732_v13  ;;  %v759_v17 = vpop.f32.mrf.mxu3  ;;  %v2145_v13 = vld [vmem:[#allocation8 + $0x104] sm:$0xf]  ;;  %v1960_v14 = vor.u32 %v2154_v7, %v1957_v8  ;;  %v1788_v8 = vor.u32 %v2117_v63, %v1787_v62  ;;  %v1899_v63 = vld [vmem:[#allocation8 + $0xd0] sm:$0xf] }
  0xe6   :  { %v760_v18 = vadd.f32 %v759_v17, %v746_v16  ;;  %v1923_v16 = vld [vmem:[#allocation8 + $0x108] sm:$0xf]  ;;  %1291 = vmatpush.bf16.msrb.mxu0 %v1960_v14 }
  0xe7   :  { %v2150_v17 = vld [vmem:[#allocation8 + $0x124] sm:$0xf0] }
  0xe8   :  { %v763_v20 = vmax.f32 %v760_v18, 0.0  ;;  %v2146_v18 = vld [vmem:[#allocation8 + $0x10c] sm:$0xf]  ;;  %v1924_v22 = vor.u32 %v2150_v17, %v1923_v16  ;;  %v2175_v16 = vld [vmem:[#allocation8 + $0x1ec] sm:$0xf0] }
  0xe9   :  { %v2171_v17 = vld [vmem:[#allocation8 + $0x1d4] sm:$0xf] }
  0xea   :  { %v789_v21 = vpack.c.bf16 %v763_v20, %v762_v19  ;;  %v1925_v19 = vld [vmem:[#allocation8 + $0x128] sm:$0xf0]  ;;  %v1916_v20 = vor.u32 %v2149_v12, %v1915_v11  ;;  %1278 = vmatpush.bf16.msrb.mxu1 %v1924_v22  ;;  %v1792_v11 = vor.u32 %v2113_v1, %v1789_v2  ;;  %v1796_v12 = vor.u32 %v2118_v4, %v1795_v3  ;;  %v2172_v22 = vld [vmem:[#allocation8 + $0x1dc] sm:$0xf]  ;;  %v2139_v1 = vld [vmem:[#allocation8 + $0xd4] sm:$0xf] }
  0xeb   :  { %v1901_v3 = vld [vmem:[#allocation8 + $0xf0] sm:$0xf0]  ;;  %v1907_v4 = vld [vmem:[#allocation8 + $0xd8] sm:$0xf] }
  0xec   :  { %799 = vmatmul.bf16.vlgmr.msra.gmra.mxu0 %v789_v21  ;;  %v1920_v21 = vor.u32 %v2145_v13, %v1917_v15  ;;  %1250 = vmatpush.bf16.msra.mxu2 %v1916_v20  ;;  %v1800_v13 = vor.u32 %v2114_v5, %v1797_v6  ;;  %v2027_v15 = vld [vmem:[#allocation8 + $0x1d0] sm:$0xf]  ;;  %v2144_v5 = vld [vmem:[#allocation8 + $0xf4] sm:$0xf0]  ;;  %v1904_v6 = vor.u32 %v2139_v1, %v1901_v3 }
  0xee   :  { %1264 = vmatpush.bf16.msra.mxu3 %v1920_v21 }
 0x169   :  { %v800_v26 = vpop.f32.mrf.mxu0 }
 0x16a   :  { %v2492_v27 = vadd.f32 %v2191_v25, %v800_v26  ;;  %v1928_v26 = vor.u32 %v2146_v18, %v1925_v19  ;;  %v2028_v18 = vor.u32 %v2175_v16, %v2027_v15  ;;  %v2035_v19 = vld [vmem:[#allocation8 + $0x1d8] sm:$0xf] }
 0x16c   :  { %v805_v28 = vmul.f32 0.5, %v2492_v27  ;;  %1455 = vst [vmem:[#allocation11] sm:$0xff] %v2492_v27  ;;  %1292 = vmatpush.bf16.msrb.mxu0 %v1928_v26  ;;  %v2167_v26 = vld [vmem:[#allocation8 + $0x1ac] sm:$0xf0] }
 0x16e   :  { %v807_v29 = vmul.f32 1.442695, %v805_v28  ;;  %v1885_v28 = vld [vmem:[#allocation8 + $0xe0] sm:$0xf0] }
 0x170   :  { %2193 = vpow2.f32 %v807_v29  ;;  %v1891_v29 = vld [vmem:[#allocation8 + $0xc8] sm:$0xf] }
 0x171   :  { %v802_v30 = vpop.f32.mrf.mxu0 }
 0x172   :  { %v2496_v31 = vadd.f32 %v2191_v25, %v802_v30  ;;  %v2137_v25 = vld [vmem:[#allocation8 + $0xc4] sm:$0xf]  ;;  %v2142_v30 = vld [vmem:[#allocation8 + $0xe4] sm:$0xf0] }
 0x174   :  { %v806_v33 = vmul.f32 0.5, %v2496_v31  ;;  %1456 = vst [vmem:[#allocation11 + $0x8] sm:$0xff] %v2496_v31 }
 0x175   :  { %1482 = dma.vmem_to_hbm [thread:$0]  %s1475_s24, 256, %s1477_s27, [#allocation12], %s2422_s17, %s2422_s17, %s2423_s18  }
 0x176   :  { %v2194_v34 = vpop.eup %2193  ;;  %v809_v35 = vmul.f32 1.442695, %v806_v33  ;;  %v1893_v33 = vld [vmem:[#allocation8 + $0xe8] sm:$0xf0] }
 0x177   :  { %v821_v36 = vmul.f32 %v2194_v34, %v816_v32  ;;  %v2138_v32 = vld [vmem:[#allocation8 + $0xcc] sm:$0xf]  ;;  %v1884_v34 = vor.u32 %v2141_v24, %v1883_v23  ;;  %v2037_v23 = vld [vmem:[#allocation8 + $0x1f8] sm:$0xf0] }
 0x178   :  { %2195 = vpow2.f32 %v809_v35  ;;  %v1888_v35 = vor.u32 %v2137_v25, %v1885_v28  ;;  %v1896_v40 = vor.u32 %v2138_v32, %v1893_v33  ;;  %v2040_v24 = vor.u32 %v2172_v22, %v2037_v23  ;;  %v1995_v25 = vld [vmem:[#allocation8 + $0x190] sm:$0xf]  ;;  %v2163_v28 = vld [vmem:[#allocation8 + $0x194] sm:$0xf]  ;;  %v2003_v32 = vld [vmem:[#allocation8 + $0x198] sm:$0xf] }
 0x179   :  { %825 = vrot.lane.b32.xlu1 %v821_v36, %s2425_s3  ;;  %v1892_v36 = vor.u32 %v2142_v30, %v1891_v29  ;;  %1251 = vmatpush.bf16.msra.mxu2 %v1884_v34  ;;  %v1996_v29 = vor.u32 %v2167_v26, %v1995_v25  ;;  %v1997_v30 = vld [vmem:[#allocation8 + $0x1b0] sm:$0xf0]  ;;  %v2168_v33 = vld [vmem:[#allocation8 + $0x1b4] sm:$0xf0] }
 0x17a   :  { %1265 = vmatpush.bf16.msra.mxu3 %v1888_v35  ;;  %1293 = vmatpush.bf16.msrb.mxu0 %v1896_v40  ;;  %v2000_v34 = vor.u32 %v2163_v28, %v1997_v30  ;;  %v2004_v35 = vor.u32 %v2168_v33, %v2003_v32  ;;  %v2159_v40 = vld [vmem:[#allocation8 + $0x16c] sm:$0xf0]  ;;  %v2123_v23 = vld [vmem:[#allocation8 + $0x54] sm:$0xf]  ;;  %v1843_v25 = vld [vmem:[#allocation8 + $0x58] sm:$0xf] }
 0x17b   :  { %1279 = vmatpush.bf16.msrb.mxu1 %v1892_v36  ;;  %v2164_v36 = vld [vmem:[#allocation8 + $0x19c] sm:$0xf]  ;;  %v2128_v28 = vld [vmem:[#allocation8 + $0x74] sm:$0xf0] }
 0x17c   :  { %v1845_v30 = vld [vmem:[#allocation8 + $0x78] sm:$0xf0]  ;;  %v1844_v33 = vor.u32 %v2128_v28, %v1843_v25 }
 0x17e   :  { %v2196_v38 = vpop.eup %2195  ;;  %1294 = vmatpush.bf16.msrb.mxu0 %v1864_v53  ;;  %v2147_v53 = vld [vmem:[#allocation8 + $0x114] sm:$0xf] }
 0x17f   :  { %v822_v39 = vmul.f32 %v2196_v38, %v818_v37  ;;  %v1851_v37 = vld [vmem:[#allocation8 + $0x80] sm:$0xf]  ;;  %1280 = vmatpush.bf16.msrb.mxu1 %v1860_v49  ;;  %v1973_v49 = vld [vmem:[#allocation8 + $0x178] sm:$0xf0]  ;;  %v1936_v58 = vor.u32 %v2147_v53, %v1933_v55 }
 0x180   :  { %v2133_v38 = vld [vmem:[#allocation8 + $0x9c] sm:$0xf0] }
 0x181   :  { %827 = vrot.lane.b32.xlu1 %v822_v39, %s2425_s3  ;;  %v2129_v39 = vld [vmem:[#allocation8 + $0x84] sm:$0xf]  ;;  %v1852_v47 = vor.u32 %v2133_v38, %v1851_v37  ;;  %v2005_v37 = vld [vmem:[#allocation8 + $0x1b8] sm:$0xf0] }
 0x182   :  { %v1856_v48 = vor.u32 %v2129_v39, %v1853_v41  ;;  %1295 = vmatpush.bf16.msrb.mxu0 %v1832_v0  ;;  %v2008_v38 = vor.u32 %v2164_v36, %v2005_v37  ;;  %v1963_v39 = vld [vmem:[#allocation8 + $0x150] sm:$0xf]  ;;  %v2155_v41 = vld [vmem:[#allocation8 + $0x154] sm:$0xf] }
 0x183   :  { %1252 = vmatpush.bf16.msra.mxu2 %v1852_v47  ;;  %1281 = vmatpush.bf16.msrb.mxu1 %v1828_v61  ;;  %v1964_v42 = vor.u32 %v2159_v40, %v1963_v39  ;;  %v1972_v47 = vor.u32 %v2160_v45, %v1971_v44  ;;  %v1941_v61 = vld [vmem:[#allocation8 + $0x138] sm:$0xf0]  ;;  %v2143_v0 = vld [vmem:[#allocation8 + $0xec] sm:$0xf0]  ;;  %v2115_v36 = vld [vmem:[#allocation8 + $0x14] sm:$0xf] }
 0x184   :  { %1266 = vmatpush.bf16.msra.mxu3 %v1856_v48  ;;  %v2156_v48 = vld [vmem:[#allocation8 + $0x15c] sm:$0xf]  ;;  %v1900_v2 = vor.u32 %v2143_v0, %v1899_v63  ;;  %v1811_v39 = vld [vmem:[#allocation8 + $0x18] sm:$0xf] }
 0x185   :  { %v1976_v50 = vor.u32 %v2156_v48, %v1973_v49  ;;  %v2120_v40 = vld [vmem:[#allocation8 + $0x34] sm:$0xf0]  ;;  %v2192_v48 = vld [vmem:[#allocation7 + $0x2] ss:$0 sm:$0xff] }
 0x186   :  { %1296 = vmatpush.bf16.msrb.mxu0 %v1800_v13  ;;  %v2131_v13 = vld [vmem:[#allocation8 + $0x94] sm:$0xf]  ;;  %v1812_v45 = vor.u32 %v2120_v40, %v1811_v39 }
 0x187   :  { %1253 = vmatpush.bf16.msra.mxu2 %v1820_v59  ;;  %1282 = vmatpush.bf16.msrb.mxu1 %v1796_v12  ;;  %v1940_v59 = vor.u32 %v2152_v57, %v1939_v56  ;;  %v2135_v12 = vld [vmem:[#allocation8 + $0xac] sm:$0xf0] }
 0x188   :  { %1267 = vmatpush.bf16.msra.mxu3 %v1824_v60  ;;  %v2148_v60 = vld [vmem:[#allocation8 + $0x11c] sm:$0xf] }
 0x189   :  { %v1944_v62 = vor.u32 %v2148_v60, %v1941_v61 }
 0x18a   :  { %1345 = vmatpush.bf16.msra.mxu0 %v2040_v24  ;;  %v1837_v24 = vld [vmem:[#allocation8 + $0x70] sm:$0xf0] }
 0x18b   :  { %1254 = vmatpush.bf16.msra.mxu2 %v1788_v8  ;;  %v2140_v8 = vld [vmem:[#allocation8 + $0xdc] sm:$0xf]  ;;  %v1840_v32 = vor.u32 %v2123_v23, %v1837_v24 }
 0x18c   :  { %1268 = vmatpush.bf16.msra.mxu3 %v1792_v11 }
 0x18e   :  { %1346 = vmatpush.bf16.msra.mxu0 %v2008_v38  ;;  %v1805_v38 = vld [vmem:[#allocation8 + $0x30] sm:$0xf0] }
 0x18f   :  { %1303 = vmatpush.bf16.msrb.mxu2 %v2028_v18  ;;  %v2136_v18 = vld [vmem:[#allocation8 + $0xb4] sm:$0xf0]  ;;  %v1808_v44 = vor.u32 %v2115_v36, %v1805_v38 }
 0x192   :  { %1347 = vmatpush.bf16.msra.mxu0 %v1976_v50 }
 0x193   :  { %1304 = vmatpush.bf16.msrb.mxu2 %v1996_v29  ;;  %v2124_v29 = vld [vmem:[#allocation8 + $0x5c] sm:$0xf] }
 0x194   :  { %v1848_v37 = vor.u32 %v2124_v29, %v1845_v30 }
 0x196   :  { %1348 = vmatpush.bf16.msra.mxu0 %v1944_v62 }
 0x197   :  { %1305 = vmatpush.bf16.msrb.mxu2 %v1964_v42  ;;  %v1813_v42 = vld [vmem:[#allocation8 + $0x38] sm:$0xf0] }
 0x19b   :  { %1306 = vmatpush.bf16.msrb.mxu2 %v1932_v54 }
 0x19f   :  { %1307 = vmatpush.bf16.msrb.mxu2 %v1900_v2 }
 0x1eb   :  { %v826_v46 = vpop.permute.xlu1 %825 }
 0x1ec   :  { %v831_v9 = vadd.f32 %v826_v46, %v2492_v27  ;;  %v2029_v27 = vld [vmem:[#allocation8 + $0x1f0] sm:$0xf0]  ;;  %v1968_v46 = vor.u32 %v2155_v41, %v1965_v43  ;;  %v2116_v41 = vld [vmem:[#allocation8 + $0x1c] sm:$0xf] }
 0x1ed   :  { %v2032_v20 = vor.u32 %v2171_v17, %v2029_v27  ;;  %v1875_v17 = vld [vmem:[#allocation8 + $0x98] sm:$0xf]  ;;  %v2132_v27 = vld [vmem:[#allocation8 + $0x9c] sm:$0xf] }
 0x1ef   :  { %1317 = vmatpush.bf16.msrb.mxu3 %v2032_v20  ;;  %v1835_v20 = vld [vmem:[#allocation8 + $0x50] sm:$0xf] }
 0x1f3   :  { %v828_v7 = vpop.permute.xlu1 %827  ;;  %1318 = vmatpush.bf16.msrb.mxu3 %v2000_v34  ;;  %v1803_v34 = vld [vmem:[#allocation8 + $0x10] sm:$0xf] }
 0x1f4   :  { %v832_v10 = vadd.f32 %v828_v7, %v2496_v31  ;;  %v2176_v31 = vld [vmem:[#allocation8 + $0x1f4] sm:$0xf0]  ;;  %v1908_v7 = vor.u32 %v2144_v5, %v1907_v4 }
 0x1f5   :  { %v2036_v21 = vor.u32 %v2176_v31, %v2035_v19  ;;  %v1876_v19 = vor.u32 %v2136_v18, %v1875_v17  ;;  %v1877_v31 = vld [vmem:[#allocation8 + $0xb8] sm:$0xf0] }
 0x1f6   :  { %v836_v14 = vpack.c.bf16 %v832_v10, %v831_v9  ;;  %v1909_v9 = vld [vmem:[#allocation8 + $0xf8] sm:$0xf0]  ;;  %v1867_v10 = vld [vmem:[#allocation8 + $0x90] sm:$0xf]  ;;  %v1880_v22 = vor.u32 %v2132_v27, %v1877_v31 }
 0x1f7   :  { %1319 = vmatpush.bf16.msrb.mxu3 %v1968_v46  ;;  %v1912_v11 = vor.u32 %v2140_v8, %v1909_v9  ;;  %v1868_v15 = vor.u32 %v2135_v12, %v1867_v10  ;;  %v1816_v46 = vor.u32 %v2116_v41, %v1813_v42 }
 0x1f8   :  { %1784 = vmatmul.msk.bf16.vlgmr.msra.gmra.mxu1 %vm838_vm1, %v836_v14  ;;  %v1869_v14 = vld [vmem:[#allocation8 + $0xb0] sm:$0xf0] }
 0x1f9   :  { %1331 = vmatpush.bf16.msra.mxu1 %v2036_v21  ;;  %v1872_v16 = vor.u32 %v2131_v13, %v1869_v14  ;;  %1349 = vmatpush.bf16.msra.mxu0 %v1912_v11  ;;  %v2127_v21 = vld [vmem:[#allocation8 + $0x6c] sm:$0xf0] }
 0x1fa   :  { %1308 = vmatpush.bf16.msrb.mxu2 %v1868_v15  ;;  %v1836_v26 = vor.u32 %v2127_v21, %v1835_v20 }
 0x1fb   :  { %1320 = vmatpush.bf16.msrb.mxu3 %v1936_v58 }
 0x1fd   :  { %1332 = vmatpush.bf16.msra.mxu1 %v2004_v35  ;;  %v2119_v35 = vld [vmem:[#allocation8 + $0x2c] sm:$0xf0]  ;;  %1350 = vmatpush.bf16.msra.mxu0 %v1880_v22 }
 0x1fe   :  { %1309 = vmatpush.bf16.msrb.mxu2 %v1836_v26  ;;  %v1804_v43 = vor.u32 %v2119_v35, %v1803_v34 }
 0x1ff   :  { %1321 = vmatpush.bf16.msrb.mxu3 %v1904_v6 }
 0x201   :  { %1333 = vmatpush.bf16.msra.mxu1 %v1972_v47  ;;  %1351 = vmatpush.bf16.msra.mxu0 %v1848_v37 }
 0x202   :  { %1310 = vmatpush.bf16.msrb.mxu2 %v1804_v43 }
 0x203   :  { %1322 = vmatpush.bf16.msrb.mxu3 %v1872_v16 }
 0x205   :  { %1334 = vmatpush.bf16.msra.mxu1 %v1940_v59  ;;  %1352 = vmatpush.bf16.msra.mxu0 %v1816_v46 }
 0x207   :  { %1323 = vmatpush.bf16.msrb.mxu3 %v1840_v32 }
 0x209   :  { %1335 = vmatpush.bf16.msra.mxu1 %v1908_v7 }
 0x20b   :  { %1324 = vmatpush.bf16.msrb.mxu3 %v1808_v44 }
 0x20d   :  { %1336 = vmatpush.bf16.msra.mxu1 %v1876_v19 }
 0x211   :  { %1337 = vmatpush.bf16.msra.mxu1 %v1844_v33 }
 0x215   :  { %1338 = vmatpush.bf16.msra.mxu1 %v1812_v45 }
 0x275   :  { %v855_v47 = vpop.f32.mrf.mxu1 }
 0x276   :  { %v856_v49 = vadd.f32 %v2192_v48, %v855_v47 }
 0x278   :  { %v860_v52 = vmax.f32 %v856_v49, 0.0 }
 0x27d   :  { %v857_v50 = vpop.f32.mrf.mxu1 }
 0x27e   :  { %v858_v51 = vadd.f32 %v2192_v48, %v857_v50 }
 0x280   :  { %v861_v53 = vmax.f32 %v858_v51, 0.0 }
 0x282   :  { %v862_v54 = vpack.c.bf16 %v861_v53, %v860_v52 }
 0x284   :  { %1255 = vmatmul.bf16.vlgmr.msra.gmra.mxu2 %v862_v54  ;;  %1269 = vmatmul.bf16.vlgmr.msra.gmra.mxu3 %v862_v54 }
 0x285   :  { %1283 = vmatmul.bf16.vlgmr.msrb.gmra.mxu1 %v862_v54  ;;  %1297 = vmatmul.bf16.vlgmr.msrb.gmra.mxu0 %v862_v54 }
 0x294   :  { %1311 = vmatmul.bf16.vlgmr.msrb.gmra.mxu2 %v862_v54  ;;  %1325 = vmatmul.bf16.vlgmr.msrb.gmra.mxu3 %v862_v54 }
 0x295   :  { %1339 = vmatmul.bf16.vlgmr.msra.gmra.mxu1 %v862_v54  ;;  %1353 = vmatmul.bf16.vlgmr.msra.gmra.mxu0 %v862_v54 }
 0x302   :  { %v1284_v55 = vpop.f32.mrf.mxu1  ;;  %v1298_v56 = vpop.f32.mrf.mxu0 }
 0x303   :  { %v1361_v57 = vsub.f32 0.0, %v1284_v55  ;;  %v1362_v58 = vsub.f32 0.0, %v1298_v56 }
 0x305   :  { %v1379_v59 = vmul.f32 1.442695, %v1361_v57  ;;  %v1381_v60 = vmul.f32 1.442695, %v1362_v58 }
 0x307   :  { %2197 = vpow2.f32 %v1379_v59  ;;  %v1256_v61 = vpop.f32.mrf.mxu2  ;;  %v1270_v62 = vpop.f32.mrf.mxu3 }
 0x308   :  { %2199 = vpow2.f32 %v1381_v60  ;;  %v1359_v63 = vsub.f32 0.0, %v1256_v61  ;;  %v1360_v0 = vsub.f32 0.0, %v1270_v62 }
 0x30a   :  { %v1375_v1 = vmul.f32 1.442695, %v1359_v63  ;;  %v1377_v2 = vmul.f32 1.442695, %v1360_v0  ;;  %v1286_v3 = vpop.f32.mrf.mxu1  ;;  %v1300_v4 = vpop.f32.mrf.mxu0 }
 0x30b   :  { %v1369_v5 = vsub.f32 0.0, %v1286_v3  ;;  %v1370_v6 = vsub.f32 0.0, %v1300_v4 }
 0x30c   :  { %2201 = vpow2.f32 %v1375_v1 }
 0x30d   :  { %v2198_v7 = vpop.eup %2197  ;;  %2203 = vpow2.f32 %v1377_v2  ;;  %v1395_v8 = vmul.f32 1.442695, %v1369_v5  ;;  %v1397_v11 = vmul.f32 1.442695, %v1370_v6 }
 0x30e   :  { %v2200_v9 = vpop.eup %2199  ;;  %v1409_v10 = vadd.f32 1.0, %v2198_v7 }
 0x30f   :  { %v1410_v12 = vadd.f32 1.0, %v2200_v9  ;;  %2205 = vpow2.f32 %v1395_v8  ;;  %v1258_v13 = vpop.f32.mrf.mxu2  ;;  %v1272_v14 = vpop.f32.mrf.mxu3 }
 0x310   :  { %2207 = vrcp.f32 %v1409_v10  ;;  %v1367_v15 = vsub.f32 0.0, %v1258_v13  ;;  %v1368_v16 = vsub.f32 0.0, %v1272_v14 }
 0x311   :  { %2209 = vrcp.f32 %v1410_v12 }
 0x312   :  { %v2202_v17 = vpop.eup %2201  ;;  %2211 = vpow2.f32 %v1397_v11  ;;  %v1391_v18 = vmul.f32 1.442695, %v1367_v15  ;;  %v1340_v27 = vpop.f32.mrf.mxu1  ;;  %v1393_v21 = vmul.f32 1.442695, %v1368_v16 }
 0x313   :  { %v1354_v19 = vpop.f32.mrf.mxu0  ;;  %v2204_v31 = vpop.eup %2203  ;;  %v1407_v20 = vadd.f32 1.0, %v2202_v17  ;;  %v1365_v22 = vsub.f32 0.0, %v1340_v27 }
 0x314   :  { %v1366_v23 = vsub.f32 0.0, %v1354_v19  ;;  %v1408_v24 = vadd.f32 1.0, %v2204_v31  ;;  %2213 = vpow2.f32 %v1391_v18 }
 0x315   :  { %v2206_v25 = vpop.eup %2205  ;;  %2215 = vrcp.f32 %v1407_v20  ;;  %v1387_v26 = vmul.f32 1.442695, %v1365_v22 }
 0x316   :  { %v2208_v28 = vpop.eup %2207  ;;  %2217 = vrcp.f32 %v1408_v24  ;;  %v1417_v29 = vadd.f32 1.0, %v2206_v25  ;;  %v1389_v30 = vmul.f32 1.442695, %v1366_v23 }
 0x317   :  { %v2210_v32 = vpop.eup %2209  ;;  %2219 = vpow2.f32 %v1393_v21  ;;  %v1312_v33 = vpop.f32.mrf.mxu2 }
 0x318   :  { %v1326_v34 = vpop.f32.mrf.mxu3  ;;  %v2212_v35 = vpop.eup %2211  ;;  %v1440_v36 = vpack.c.bf16 %v2210_v32, %v2208_v28  ;;  %2221 = vrcp.f32 %v1417_v29  ;;  %v1363_v37 = vsub.f32 0.0, %v1312_v33 }
 0x319   :  { %v1364_v38 = vsub.f32 0.0, %v1326_v34  ;;  %v1418_v39 = vadd.f32 1.0, %v2212_v35  ;;  %2223 = vpow2.f32 %v1387_v26 }
 0x31a   :  { %v2214_v40 = vpop.eup %2213  ;;  %1448 = vst [vmem:[#allocation10 + $0x8] sm:$0xff] %v1440_v36  ;;  %2225 = vpow2.f32 %v1389_v30  ;;  %v1383_v41 = vmul.f32 1.442695, %v1363_v37  ;;  %v1342_v43 = vpop.f32.mrf.mxu1 }
 0x31b   :  { %v1385_v42 = vmul.f32 1.442695, %v1364_v38  ;;  %v1356_v44 = vpop.f32.mrf.mxu0  ;;  %v2216_v45 = vpop.eup %2215  ;;  %2227 = vrcp.f32 %v1418_v39  ;;  %v1415_v46 = vadd.f32 1.0, %v2214_v40  ;;  %v1373_v47 = vsub.f32 0.0, %v1342_v43 }
 0x31c   :  { %v1374_v48 = vsub.f32 0.0, %v1356_v44  ;;  %v2218_v49 = vpop.eup %2217  ;;  %2229 = vpow2.f32 %v1383_v41 }
 0x31d   :  { %v2220_v50 = vpop.eup %2219  ;;  %v1439_v51 = vpack.c.bf16 %v2218_v49, %v2216_v45  ;;  %2231 = vrcp.f32 %v1415_v46  ;;  %v1403_v52 = vmul.f32 1.442695, %v1373_v47 }
 0x31e   :  { %v1405_v53 = vmul.f32 1.442695, %v1374_v48  ;;  %v2222_v54 = vpop.eup %2221  ;;  %v1416_v55 = vadd.f32 1.0, %v2220_v50  ;;  %2233 = vpow2.f32 %v1385_v42 }
 0x31f   :  { %v2224_v56 = vpop.eup %2223  ;;  %1447 = vst [vmem:[#allocation10] sm:$0xff] %v1439_v51  ;;  %2235 = vpow2.f32 %v1403_v52  ;;  %v1314_v57 = vpop.f32.mrf.mxu2 }
 0x320   :  { %v1328_v58 = vpop.f32.mrf.mxu3  ;;  %v2226_v59 = vpop.eup %2225  ;;  %2237 = vrcp.f32 %v1416_v55  ;;  %v1413_v60 = vadd.f32 1.0, %v2224_v56  ;;  %v1371_v61 = vsub.f32 0.0, %v1314_v57 }
 0x321   :  { %v1372_v62 = vsub.f32 0.0, %v1328_v58  ;;  %v2228_v63 = vpop.eup %2227  ;;  %v1414_v0 = vadd.f32 1.0, %v2226_v59  ;;  %2239 = vpow2.f32 %v1405_v53 }
 0x322   :  { %v2230_v1 = vpop.eup %2229  ;;  %v1444_v2 = vpack.c.bf16 %v2228_v63, %v2222_v54  ;;  %2241 = vrcp.f32 %v1413_v60  ;;  %v1399_v3 = vmul.f32 1.442695, %v1371_v61 }
 0x323   :  { %v1401_v4 = vmul.f32 1.442695, %v1372_v62  ;;  %v2232_v5 = vpop.eup %2231  ;;  %2243 = vrcp.f32 %v1414_v0  ;;  %v1411_v6 = vadd.f32 1.0, %v2230_v1 }
 0x324   :  { %v2234_v7 = vpop.eup %2233  ;;  %1452 = vst [vmem:[#allocation10 + $0x28] sm:$0xff] %v1444_v2  ;;  %2245 = vpow2.f32 %v1399_v3 }
 0x325   :  { %v2236_v8 = vpop.eup %2235  ;;  %2247 = vrcp.f32 %v1411_v6  ;;  %v1412_v9 = vadd.f32 1.0, %v2234_v7 }
 0x326   :  { %v2238_v10 = vpop.eup %2237  ;;  %v1421_v11 = vadd.f32 1.0, %v2236_v8  ;;  %2249 = vpow2.f32 %v1401_v4 }
 0x327   :  { %v2240_v12 = vpop.eup %2239  ;;  %v1443_v13 = vpack.c.bf16 %v2238_v10, %v2232_v5  ;;  %2251 = vrcp.f32 %v1412_v9 }
 0x328   :  { %v2242_v14 = vpop.eup %2241  ;;  %2253 = vrcp.f32 %v1421_v11  ;;  %v1422_v15 = vadd.f32 1.0, %v2240_v12 }
 0x329   :  { %v2244_v16 = vpop.eup %2243  ;;  %1451 = vst [vmem:[#allocation10 + $0x20] sm:$0xff] %v1443_v13 }
 0x32a   :  { %v2246_v17 = vpop.eup %2245  ;;  %v1442_v18 = vpack.c.bf16 %v2244_v16, %v2242_v14  ;;  %2255 = vrcp.f32 %v1422_v15 }
 0x32b   :  { %v2248_v27 = vpop.eup %2247  ;;  %v1419_v19 = vadd.f32 1.0, %v2246_v17 }
 0x32c   :  { %v2250_v31 = vpop.eup %2249  ;;  %1450 = vst [vmem:[#allocation10 + $0x18] sm:$0xff] %v1442_v18 }
 0x32d   :  { %v2252_v20 = vpop.eup %2251  ;;  %2257 = vrcp.f32 %v1419_v19  ;;  %v1420_v21 = vadd.f32 1.0, %v2250_v31 }
 0x32e   :  { %v2254_v22 = vpop.eup %2253  ;;  %v1441_v23 = vpack.c.bf16 %v2252_v20, %v2248_v27 }
 0x32f   :  { %2259 = vrcp.f32 %v1420_v21 }
 0x330   :  { %v2256_v24 = vpop.eup %2255  ;;  %1449 = vst [vmem:[#allocation10 + $0x10] sm:$0xff] %v1441_v23 }
 0x331   :  { %v1446_v25 = vpack.c.bf16 %v2256_v24, %v2254_v22 }
 0x333   :  { %v2258_v26 = vpop.eup %2257  ;;  %1454 = vst [vmem:[#allocation10 + $0x38] sm:$0xff] %v1446_v25 }
 0x335   :  { %v2260_v28 = vpop.eup %2259 }
 0x336   :  { %v1445_v29 = vpack.c.bf16 %v2260_v28, %v2258_v26 }
 0x338   :  { %1453 = vst [vmem:[#allocation10 + $0x30] sm:$0xff] %v1445_v29 }
 0x339   :  { %1469 = dma.vmem_to_hbm [thread:$0]  %s1462_s28, 1024, %s1464_s7, [#allocation4], %s2419_s9, %s2419_s9, %s2420_s10  }
 0x33a   :  { %2411 = dma.done.wait [#allocation4], 1024  }
 0x33b   :  { %2412 = vsyncadd [#allocation4], 4294966272 }
 0x33c   :  { %2413 = dma.done.wait [#allocation12], 256  }
 0x33d   :  { %2414 = vsyncadd [#allocation12], 4294967040 }
 0x33e   :  { %1491 = vsyncpa [#allocation3], 1 }
 0x33f   :  { %1492 = vsyncpa [#allocation6], 1 }
 0x340   :  { %1493 = vsyncpa [#allocation9], 1 }
 0x341   :  { %1494 = vsyncpa [#allocation4], 1 }
 0x342   :  { %1495 = vsyncpa [#allocation12], 1 }

</bundles_post_ra>
